<compile_context>
chip_gen: v7x
topology: tpu7x:2x2x1
jax: 0.10.0
libtpu: 0.0.40
codegen_flags: <defaults>
</compile_context>

<pallas_src>
import functools

import jax
import jax.numpy as jnp
from jax import lax
from jax.experimental import pallas as pl
from jax.experimental.pallas import tpu as pltpu

# ---- static hyperparameters (small, consistent with the module __init__) ----
DATA_DIM   = 4      # number of population types (data_dim)
NUM_BLOCKS = 2      # fitness_blocks
HIDDEN_DIM = 32     # embed_dim
LEARNABLE_SKIP = True

MIN_TB = 128        # lane granularity (last block dim must be a multiple of 128)
MAX_TB = 2048       # cap on batch-tile lane width


def _round_up(x, m):
    return ((x + m - 1) // m) * m


def _tiling(batch):
    """Pick (tile_width, padded_batch).  Tiles are lane-dense multiples of 128 and as
    wide as possible (<= MAX_TB), but we keep >= 2 tiles whenever the batch allows so
    the "parallel" grid axis can be sharded across both v7x TensorCores."""
    b128 = _round_up(max(int(batch), 1), MIN_TB)
    tb = min(MAX_TB, _round_up(max(b128 // 2, MIN_TB), MIN_TB))
    b_pad = _round_up(b128, tb)
    return tb, b_pad


# --------------------------- kernel-side math (feature-major) ---------------------------
def _prep_weights(alpha_ref, w_in_ref, b_in_ref, w_blk_ref, b_blk_ref,
                  w_out_ref, b_out_ref, tb):
    """Load weights once per kernel invocation and pre-broadcast every bias and every
    tiny D=4 projection column to the full [.., tb] lane width.  Hoisted here because
    JAX does not CSE broadcast_in_dim (doing it inside the Euler loop would
    re-broadcast per step)."""
    H = HIDDEN_DIM
    # Input projection columns (used as VPU outer-product terms): [H, tb] each.
    w_in_cols = tuple(jnp.broadcast_to(w_in_ref[:, d:d + 1], (H, tb))
                      for d in range(DATA_DIM))
    b_in_b = jnp.broadcast_to(b_in_ref[...], (H, tb))
    # Residual tanh blocks: [H, H] matrices stay un-broadcast (MXU operands).
    w_blk = tuple(w_blk_ref[k] for k in range(NUM_BLOCKS))
    b_blk_b = tuple(jnp.broadcast_to(b_blk_ref[k], (H, tb)) for k in range(NUM_BLOCKS))
    # Output projection columns (VPU multiply + cross-sublane reduce): [H, tb] each.
    w_out_cols = tuple(jnp.broadcast_to(w_out_ref[:, d:d + 1], (H, tb))
                       for d in range(DATA_DIM))
    b_out_rows = tuple(jnp.broadcast_to(b_out_ref[d:d + 1, :], (1, tb))
                       for d in range(DATA_DIM))
    alphas = tuple(alpha_ref[k] for k in range(NUM_BLOCKS))   # learnable skip scalars
    return (w_in_cols, b_in_b, w_blk, b_blk_b, w_out_cols, b_out_rows, alphas)


def _replicator_rhs_rows(x_rows, w):
    """Replicator RHS in feature-major row form.  x_rows: DATA_DIM rows of shape
    [1, tb].  Returns DATA_DIM rows of dx/dt, shape [1, tb] each."""
    w_in_cols, b_in_b, w_blk, b_blk_b, w_out_cols, b_out_rows, alphas = w

    # --- fitness: input projection (K = 4) as VPU outer-product accumulation ---
    h = b_in_b                                                   # [H, tb]
    for d in range(DATA_DIM):                                    # static unroll
        h = h + w_in_cols[d] * x_rows[d]                         # [H,tb] * [1,tb]

    # --- fitness: residual tanh blocks (H x H) on the MXU ---
    for k in range(NUM_BLOCKS):                                  # static unroll
        y = jnp.tanh(jnp.dot(w_blk[k], h, preferred_element_type=jnp.float32)
                     + b_blk_b[k])
        h = alphas[k] * h + y                                    # learnable skip

    # --- fitness: output projection (M = 4) as VPU multiply + sublane reduce ---
    f_rows = tuple(jnp.sum(w_out_cols[d] * h, axis=0, keepdims=True) + b_out_rows[d]
                   for d in range(DATA_DIM))                     # each [1, tb]

    # --- replicator equation: dx_i = x_i * (f_i - phi),  phi = sum_j x_j f_j ---
    phi = f_rows[0] * x_rows[0]
    for d in range(1, DATA_DIM):
        phi = phi + f_rows[d] * x_rows[d]
    return tuple(x_rows[d] * (f_rows[d] - phi) for d in range(DATA_DIM))


def _rhs_kernel(alpha_ref, x_ref, w_in_ref, b_in_ref, w_blk_ref, b_blk_ref,
                w_out_ref, b_out_ref, o_ref):
    tb = x_ref.shape[-1]
    w = _prep_weights(alpha_ref, w_in_ref, b_in_ref, w_blk_ref, b_blk_ref,
                      w_out_ref, b_out_ref, tb)
    x_rows = tuple(x_ref[d:d + 1, :] for d in range(DATA_DIM))
    dx_rows = _replicator_rhs_rows(x_rows, w)
    o_ref[...] = jnp.concatenate(dx_rows, axis=0).astype(o_ref.dtype)


def _integrate_kernel(alpha_ref, dt_ref, x_ref, w_in_ref, b_in_ref, w_blk_ref,
                      b_blk_ref, w_out_ref, b_out_ref, o_ref, *, num_steps, unroll):
    tb = x_ref.shape[-1]
    dt = dt_ref[0]
    w = _prep_weights(alpha_ref, w_in_ref, b_in_ref, w_blk_ref, b_blk_ref,
                      w_out_ref, b_out_ref, tb)
    x0 = tuple(x_ref[d:d + 1, :] for d in range(DATA_DIM))

    def euler_step(_, xc):
        dx = _replicator_rhs_rows(xc, w)
        return tuple(xc[d] + dt * dx[d] for d in range(DATA_DIM))

    xf = lax.fori_loop(0, num_steps, euler_step, x0, unroll=unroll)
    o_ref[...] = jnp.concatenate(xf, axis=0).astype(o_ref.dtype)


# --------------------------------- wrapper plumbing ---------------------------------
_SMEM = pl.BlockSpec(memory_space=pltpu.MemorySpace.SMEM)


def _resident(shape):
    """Full-array VMEM block with a constant index_map -> stays resident across grid."""
    nd = len(shape)
    return pl.BlockSpec(shape, lambda i: (0,) * nd)


def _weight_specs():
    return [_resident((HIDDEN_DIM, DATA_DIM)),                 # W_in^T  [H, D]
            _resident((HIDDEN_DIM, 1)),                        # b_in^T  [H, 1]
            _resident((NUM_BLOCKS, HIDDEN_DIM, HIDDEN_DIM)),   # W_k^T   [NB, H, H]
            _resident((NUM_BLOCKS, HIDDEN_DIM, 1)),            # b_k^T   [NB, H, 1]
            _resident((HIDDEN_DIM, DATA_DIM)),                 # W_out   [H, D]
            _resident((DATA_DIM, 1))]                          # b_out^T [D, 1]


_COMPILER_PARAMS = pltpu.CompilerParams(
    dimension_semantics=("parallel",),       # batch tiles independent -> both v7x TCs
    vmem_limit_bytes=32 * 1024 * 1024)       # valid on v5e/v6e/v7x


def _io_spec(tb):
    return pl.BlockSpec((DATA_DIM, tb), lambda i: (0, i))


def prepare_params(params):
    """One-time, host-side weight relayout to the kernel's feature-major orientation.
    Call once per set of weights and reuse across all RHS / integrator calls."""
    w_in, b_in, w_blk, b_blk, alpha, w_out, b_out = params
    kernel_weights = (
        w_in.T.astype(jnp.float32),                              # [H, D]
        b_in.reshape(HIDDEN_DIM, 1).astype(jnp.float32),         # [H, 1]
        jnp.transpose(w_blk, (0, 2, 1)).astype(jnp.float32),     # [NB, H, H]
        jnp.transpose(b_blk, (0, 2, 1)).astype(jnp.float32),     # [NB, H, 1]
        w_out.astype(jnp.float32),                               # [H, D] (columns = outputs)
        b_out.reshape(DATA_DIM, 1).astype(jnp.float32))          # [D, 1]
    return jnp.asarray(alpha, jnp.float32), kernel_weights


def prepare_state(x, b_pad):
    """Batch-major [B, D] -> lane-dense feature-major [D, b_pad].  Zero padding is
    inert for the replicator equation (rhs(0) = 0)."""
    B = x.shape[0]
    return jnp.pad(x.T.astype(jnp.float32), ((0, 0), (0, b_pad - B)))


def unprepare_state(xT, batch, dtype):
    return xT[:, :batch].T.astype(dtype)


def replicator_rhs_feature_major(xT, alpha, kernel_weights, tb):
    """dx/dt in the kernel-native, pre-padded feature-major layout [D, b_pad].
    This is the path an outer ODE solver should call per step (layout cost paid once
    outside the solver loop via prepare_params / prepare_state)."""
    b_pad = xT.shape[1]
    spec = _io_spec(tb)
    return pl.pallas_call(
        _rhs_kernel,
        out_shape=jax.ShapeDtypeStruct((DATA_DIM, b_pad), jnp.float32),
        grid=(b_pad // tb,),
        in_specs=[_SMEM, spec] + _weight_specs(),
        out_specs=spec,
        compiler_params=_COMPILER_PARAMS,
    )(alpha, xT, *kernel_weights)


def replicator_rhs(t, x, params, ids=None):
    """Convenience batch-major entry: dx/dt = x * (f(x) - <x, f(x)>).  x: [B, D]."""
    del t, ids   # TODO(synk): autonomous fitness; id-embedding path not modelled.
    B = x.shape[0]
    tb, b_pad = _tiling(B)
    alpha, kw = prepare_params(params)
    xT = prepare_state(x, b_pad)
    outT = replicator_rhs_feature_major(xT, alpha, kw, tb)
    return unprepare_state(outT, B, x.dtype)


def replicator_integrate(x0, params, dt, num_steps, ids=None):
    """Fused fixed-step Euler integration of the replicator ODE inside ONE pallas_call
    (weights resident, biases pre-broadcast once, Euler loop unrolled)."""
    del ids
    B = x0.shape[0]
    tb, b_pad = _tiling(B)
    alpha, kw = prepare_params(params)
    xT = prepare_state(x0, b_pad)
    num_steps = int(num_steps)
    unroll = True if num_steps <= 32 else 8
    dt_arr = jnp.asarray(dt, jnp.float32).reshape((1,))
    spec = _io_spec(tb)
    outT = pl.pallas_call(
        functools.partial(_integrate_kernel, num_steps=num_steps, unroll=unroll),
        out_shape=jax.ShapeDtypeStruct((DATA_DIM, b_pad), jnp.float32),
        grid=(b_pad // tb,),
        in_specs=[_SMEM, _SMEM, spec] + _weight_specs(),
        out_specs=spec,
        compiler_params=_COMPILER_PARAMS,
    )(alpha, dt_arr, xT, *kw)
    return unprepare_state(outT, B, x0.dtype)


# ------------------------------ params & JAX references ------------------------------
def init_params(key):
    """Deterministic synthetic parameter init (nn.Linear-style shapes)."""
    ks = jax.random.split(key, 6)
    s_in  = 1.0 / jnp.sqrt(DATA_DIM)
    s_hid = 1.0 / jnp.sqrt(HIDDEN_DIM)
    w_in  = jax.random.uniform(ks[0], (DATA_DIM, HIDDEN_DIM), jnp.float32, -s_in, s_in)
    b_in  = jax.random.uniform(ks[1], (1, HIDDEN_DIM), jnp.float32, -s_in, s_in)
    w_blk = jax.random.uniform(ks[2], (NUM_BLOCKS, HIDDEN_DIM, HIDDEN_DIM),
                               jnp.float32, -s_hid, s_hid)
    b_blk = jax.random.uniform(ks[3], (NUM_BLOCKS, 1, HIDDEN_DIM),
                               jnp.float32, -s_hid, s_hid)
    alpha = jnp.ones((NUM_BLOCKS,), jnp.float32)   # learnable_skip init = 1.0
    w_out = jax.random.uniform(ks[4], (HIDDEN_DIM, DATA_DIM), jnp.float32, -s_hid, s_hid)
    b_out = jax.random.uniform(ks[5], (1, DATA_DIM), jnp.float32, -s_hid, s_hid)
    return (w_in, b_in, w_blk, b_blk, alpha, w_out, b_out)


def reference_rhs(t, x, params):
    del t
    w_in, b_in, w_blk, b_blk, alpha, w_out, b_out = params
    h = x @ w_in + b_in
    for k in range(NUM_BLOCKS):
        h = alpha[k] * h + jnp.tanh(h @ w_blk[k] + b_blk[k])
    f = h @ w_out + b_out
    phi = jnp.sum(x * f, axis=-1, keepdims=True)
    return x * (f - phi)


def reference_integrate(x0, params, dt, num_steps):
    def step(_, xc):
        return xc + dt * reference_rhs(0.0, xc, params)
    return lax.fori_loop(0, num_steps, step, x0)


# ------------------------------------------ demo ------------------------------------------
if __name__ == "__main__":
    key = jax.random.PRNGKey(0)
    k_param, k_x = jax.random.split(key)
    params = init_params(k_param)

    # Batch of independent trajectories on the probability simplex (replicator state).
    # B = 300 is a non-multiple of 128: pads to 512 and tiles as 2 x 256 lanes
    # (exercises the padded, multi-tile, "parallel" grid path).
    B = 300
    x = jax.nn.softmax(jax.random.normal(k_x, (B, DATA_DIM), jnp.float32), axis=-1)
    t = 0.0
    ids = jnp.arange(DATA_DIM, dtype=jnp.int32)   # per-type ids (unused, see TODO above)

    # 1) single RHS evaluation (what odeint calls), batch-major convenience path
    dx = jax.block_until_ready(replicator_rhs(t, x, params, ids))
    ref_dx = reference_rhs(t, x, params)
    assert dx.shape == (B, DATA_DIM)
    assert jnp.allclose(dx, ref_dx, atol=1e-5, rtol=1e-5), "RHS mismatch vs JAX reference"

    # 1b) feature-major fast path: layout/padding done ONCE, reused across solver steps
    tb, b_pad = _tiling(B)
    alpha, kw = prepare_params(params)
    xT = prepare_state(x, b_pad)
    dxT = jax.block_until_ready(replicator_rhs_feature_major(xT, alpha, kw, tb))
    assert jnp.allclose(unprepare_state(dxT, B, x.dtype), ref_dx, atol=1e-5, rtol=1e-5), \
        "feature-major RHS mismatch"

    # 2) fused multi-step Euler integration inside one pallas_call
    dt, num_steps = 0.05, 32
    x_final = jax.block_until_ready(replicator_integrate(x, params, dt, num_steps, ids))
    ref_final = reference_integrate(x, params, dt, num_steps)
    assert x_final.shape == (B, DATA_DIM)
    assert jnp.allclose(x_final, ref_final, atol=1e-3, rtol=1e-3), "integrator mismatch"

    print("KERNEL_OK")
</pallas_src>

<mosaic_0001>
module attributes {stable_mosaic.version = 11 : i64} {
  func.func @_rhs_kernel(%arg0: i32, %arg1: memref<2xf32, #tpu.memory_space<smem>>, %arg2: memref<4x256xf32, #tpu.memory_space<vmem>>, %arg3: memref<32x4xf32, #tpu.memory_space<vmem>>, %arg4: memref<32x1xf32, #tpu.memory_space<vmem>>, %arg5: memref<2x32x32xf32, #tpu.memory_space<vmem>>, %arg6: memref<2x32x1xf32, #tpu.memory_space<vmem>>, %arg7: memref<32x4xf32, #tpu.memory_space<vmem>>, %arg8: memref<4x1xf32, #tpu.memory_space<vmem>>, %arg9: memref<4x256xf32, #tpu.memory_space<vmem>>) attributes {dimension_semantics = [#tpu.dimension_semantics<parallel>], iteration_bounds = array<i64: 2>, scalar_prefetch = 0 : i64, scratch_operands = 0 : i64, tpu.core_type = #tpu.core_type<tc>, window_params = [{transform_indices = @transform_0, window_bounds = array<i64: 2>}, {transform_indices = @transform_1, window_bounds = array<i64: 4, 256>}, {pipeline_mode = #tpu.pipeline_mode<synchronous>, transform_indices = @transform_2, window_bounds = array<i64: 32, 4>}, {pipeline_mode = #tpu.pipeline_mode<synchronous>, transform_indices = @transform_3, window_bounds = array<i64: 32, 1>}, {pipeline_mode = #tpu.pipeline_mode<synchronous>, transform_indices = @transform_4, window_bounds = array<i64: 2, 32, 32>}, {pipeline_mode = #tpu.pipeline_mode<synchronous>, transform_indices = @transform_5, window_bounds = array<i64: 2, 32, 1>}, {pipeline_mode = #tpu.pipeline_mode<synchronous>, transform_indices = @transform_6, window_bounds = array<i64: 32, 4>}, {pipeline_mode = #tpu.pipeline_mode<synchronous>, transform_indices = @transform_7, window_bounds = array<i64: 4, 1>}, {transform_indices = @transform_8, window_bounds = array<i64: 4, 256>}]} {
    %c0 = arith.constant 0 : index
    %c0_0 = arith.constant 0 : index
    %0 = vector.load %arg3[%c0, %c0_0] : memref<32x4xf32, #tpu.memory_space<vmem>>, vector<32x1xf32>
    %1 = vector.shape_cast %0 : vector<32x1xf32> to vector<32x1xf32>
    %2 = vector.broadcast %1 : vector<32x1xf32> to vector<32x256xf32>
    %c0_1 = arith.constant 0 : index
    %c1 = arith.constant 1 : index
    %3 = vector.load %arg3[%c0_1, %c1] : memref<32x4xf32, #tpu.memory_space<vmem>>, vector<32x1xf32>
    %4 = vector.shape_cast %3 : vector<32x1xf32> to vector<32x1xf32>
    %5 = vector.broadcast %4 : vector<32x1xf32> to vector<32x256xf32>
    %c0_2 = arith.constant 0 : index
    %c2 = arith.constant 2 : index
    %6 = vector.load %arg3[%c0_2, %c2] : memref<32x4xf32, #tpu.memory_space<vmem>>, vector<32x1xf32>
    %7 = vector.shape_cast %6 : vector<32x1xf32> to vector<32x1xf32>
    %8 = vector.broadcast %7 : vector<32x1xf32> to vector<32x256xf32>
    %c0_3 = arith.constant 0 : index
    %c3 = arith.constant 3 : index
    %9 = vector.load %arg3[%c0_3, %c3] : memref<32x4xf32, #tpu.memory_space<vmem>>, vector<32x1xf32>
    %10 = vector.shape_cast %9 : vector<32x1xf32> to vector<32x1xf32>
    %11 = vector.broadcast %10 : vector<32x1xf32> to vector<32x256xf32>
    %c0_4 = arith.constant 0 : index
    %c0_5 = arith.constant 0 : index
    %12 = vector.load %arg4[%c0_4, %c0_5] : memref<32x1xf32, #tpu.memory_space<vmem>>, vector<32x1xf32>
    %13 = vector.shape_cast %12 : vector<32x1xf32> to vector<32x1xf32>
    %14 = vector.broadcast %13 : vector<32x1xf32> to vector<32x256xf32>
    %c0_6 = arith.constant 0 : index
    %c0_7 = arith.constant 0 : index
    %c0_8 = arith.constant 0 : index
    %15 = vector.load %arg5[%c0_6, %c0_7, %c0_8] : memref<2x32x32xf32, #tpu.memory_space<vmem>>, vector<1x32x32xf32>
    %16 = vector.shape_cast %15 : vector<1x32x32xf32> to vector<32x32xf32>
    %c1_9 = arith.constant 1 : index
    %c0_10 = arith.constant 0 : index
    %c0_11 = arith.constant 0 : index
    %17 = vector.load %arg5[%c1_9, %c0_10, %c0_11] : memref<2x32x32xf32, #tpu.memory_space<vmem>>, vector<1x32x32xf32>
    %18 = vector.shape_cast %17 : vector<1x32x32xf32> to vector<32x32xf32>
    %c0_12 = arith.constant 0 : index
    %c0_13 = arith.constant 0 : index
    %c0_14 = arith.constant 0 : index
    %19 = vector.load %arg6[%c0_12, %c0_13, %c0_14] : memref<2x32x1xf32, #tpu.memory_space<vmem>>, vector<1x32x1xf32>
    %20 = vector.shape_cast %19 : vector<1x32x1xf32> to vector<32x1xf32>
    %21 = vector.shape_cast %20 : vector<32x1xf32> to vector<32x1xf32>
    %22 = vector.broadcast %21 : vector<32x1xf32> to vector<32x256xf32>
    %c1_15 = arith.constant 1 : index
    %c0_16 = arith.constant 0 : index
    %c0_17 = arith.constant 0 : index
    %23 = vector.load %arg6[%c1_15, %c0_16, %c0_17] : memref<2x32x1xf32, #tpu.memory_space<vmem>>, vector<1x32x1xf32>
    %24 = vector.shape_cast %23 : vector<1x32x1xf32> to vector<32x1xf32>
    %25 = vector.shape_cast %24 : vector<32x1xf32> to vector<32x1xf32>
    %26 = vector.broadcast %25 : vector<32x1xf32> to vector<32x256xf32>
    %c0_18 = arith.constant 0 : index
    %c0_19 = arith.constant 0 : index
    %27 = vector.load %arg7[%c0_18, %c0_19] : memref<32x4xf32, #tpu.memory_space<vmem>>, vector<32x1xf32>
    %28 = vector.shape_cast %27 : vector<32x1xf32> to vector<32x1xf32>
    %29 = vector.broadcast %28 : vector<32x1xf32> to vector<32x256xf32>
    %c0_20 = arith.constant 0 : index
    %c1_21 = arith.constant 1 : index
    %30 = vector.load %arg7[%c0_20, %c1_21] : memref<32x4xf32, #tpu.memory_space<vmem>>, vector<32x1xf32>
    %31 = vector.shape_cast %30 : vector<32x1xf32> to vector<32x1xf32>
    %32 = vector.broadcast %31 : vector<32x1xf32> to vector<32x256xf32>
    %c0_22 = arith.constant 0 : index
    %c2_23 = arith.constant 2 : index
    %33 = vector.load %arg7[%c0_22, %c2_23] : memref<32x4xf32, #tpu.memory_space<vmem>>, vector<32x1xf32>
    %34 = vector.shape_cast %33 : vector<32x1xf32> to vector<32x1xf32>
    %35 = vector.broadcast %34 : vector<32x1xf32> to vector<32x256xf32>
    %c0_24 = arith.constant 0 : index
    %c3_25 = arith.constant 3 : index
    %36 = vector.load %arg7[%c0_24, %c3_25] : memref<32x4xf32, #tpu.memory_space<vmem>>, vector<32x1xf32>
    %37 = vector.shape_cast %36 : vector<32x1xf32> to vector<32x1xf32>
    %38 = vector.broadcast %37 : vector<32x1xf32> to vector<32x256xf32>
    %c0_26 = arith.constant 0 : index
    %c0_27 = arith.constant 0 : index
    %39 = vector.load %arg8[%c0_26, %c0_27] : memref<4x1xf32, #tpu.memory_space<vmem>>, vector<1x1xf32>
    %40 = vector.shape_cast %39 : vector<1x1xf32> to vector<1x1xf32>
    %41 = vector.broadcast %40 : vector<1x1xf32> to vector<1x256xf32>
    %c1_28 = arith.constant 1 : index
    %c0_29 = arith.constant 0 : index
    %42 = vector.load %arg8[%c1_28, %c0_29] : memref<4x1xf32, #tpu.memory_space<vmem>>, vector<1x1xf32>
    %43 = vector.shape_cast %42 : vector<1x1xf32> to vector<1x1xf32>
    %44 = vector.broadcast %43 : vector<1x1xf32> to vector<1x256xf32>
    %c2_30 = arith.constant 2 : index
    %c0_31 = arith.constant 0 : index
    %45 = vector.load %arg8[%c2_30, %c0_31] : memref<4x1xf32, #tpu.memory_space<vmem>>, vector<1x1xf32>
    %46 = vector.shape_cast %45 : vector<1x1xf32> to vector<1x1xf32>
    %47 = vector.broadcast %46 : vector<1x1xf32> to vector<1x256xf32>
    %c3_32 = arith.constant 3 : index
    %c0_33 = arith.constant 0 : index
    %48 = vector.load %arg8[%c3_32, %c0_33] : memref<4x1xf32, #tpu.memory_space<vmem>>, vector<1x1xf32>
    %49 = vector.shape_cast %48 : vector<1x1xf32> to vector<1x1xf32>
    %50 = vector.broadcast %49 : vector<1x1xf32> to vector<1x256xf32>
    %c0_34 = arith.constant 0 : index
    %51 = memref.load %arg1[%c0_34] : memref<2xf32, #tpu.memory_space<smem>>
    %c1_35 = arith.constant 1 : index
    %52 = memref.load %arg1[%c1_35] : memref<2xf32, #tpu.memory_space<smem>>
    %c0_36 = arith.constant 0 : index
    %c0_37 = arith.constant 0 : index
    %53 = vector.load %arg2[%c0_36, %c0_37] : memref<4x256xf32, #tpu.memory_space<vmem>>, vector<1x256xf32>
    %c1_38 = arith.constant 1 : index
    %c0_39 = arith.constant 0 : index
    %54 = vector.load %arg2[%c1_38, %c0_39] : memref<4x256xf32, #tpu.memory_space<vmem>>, vector<1x256xf32>
    %c2_40 = arith.constant 2 : index
    %c0_41 = arith.constant 0 : index
    %55 = vector.load %arg2[%c2_40, %c0_41] : memref<4x256xf32, #tpu.memory_space<vmem>>, vector<1x256xf32>
    %c3_42 = arith.constant 3 : index
    %c0_43 = arith.constant 0 : index
    %56 = vector.load %arg2[%c3_42, %c0_43] : memref<4x256xf32, #tpu.memory_space<vmem>>, vector<1x256xf32>
    %57 = vector.broadcast %53 : vector<1x256xf32> to vector<32x256xf32>
    %58 = arith.mulf %2, %57 : vector<32x256xf32>
    %59 = arith.addf %14, %58 : vector<32x256xf32>
    %60 = vector.broadcast %54 : vector<1x256xf32> to vector<32x256xf32>
    %61 = arith.mulf %5, %60 : vector<32x256xf32>
    %62 = arith.addf %59, %61 : vector<32x256xf32>
    %63 = vector.broadcast %55 : vector<1x256xf32> to vector<32x256xf32>
    %64 = arith.mulf %8, %63 : vector<32x256xf32>
    %65 = arith.addf %62, %64 : vector<32x256xf32>
    %66 = vector.broadcast %56 : vector<1x256xf32> to vector<32x256xf32>
    %67 = arith.mulf %11, %66 : vector<32x256xf32>
    %68 = arith.addf %65, %67 : vector<32x256xf32>
    %cst = arith.constant dense<0.000000e+00> : vector<32x256xf32>
    %69 = tpu.matmul %16, %68, %cst {dimension_numbers = #tpu.dot_dimension_numbers<[1], [0], [0], [1], [0, 0, 1, 1], [], []>} : vector<32x32xf32>, vector<32x256xf32>, vector<32x256xf32> -> vector<32x256xf32>
    %70 = arith.addf %69, %22 : vector<32x256xf32>
    %71 = math.tanh %70 : vector<32x256xf32>
    %72 = vector.broadcast %51 : f32 to vector<32x256xf32>
    %73 = arith.mulf %72, %68 : vector<32x256xf32>
    %74 = arith.addf %73, %71 : vector<32x256xf32>
    %cst_44 = arith.constant dense<0.000000e+00> : vector<32x256xf32>
    %75 = tpu.matmul %18, %74, %cst_44 {dimension_numbers = #tpu.dot_dimension_numbers<[1], [0], [0], [1], [0, 0, 1, 1], [], []>} : vector<32x32xf32>, vector<32x256xf32>, vector<32x256xf32> -> vector<32x256xf32>
    %76 = arith.addf %75, %26 : vector<32x256xf32>
    %77 = math.tanh %76 : vector<32x256xf32>
    %78 = vector.broadcast %52 : f32 to vector<32x256xf32>
    %79 = arith.mulf %78, %74 : vector<32x256xf32>
    %80 = arith.addf %79, %77 : vector<32x256xf32>
    %81 = arith.mulf %29, %80 : vector<32x256xf32>
    %cst_45 = arith.constant dense<0.000000e+00> : vector<256xf32>
    %82 = vector.multi_reduction <add>, %81, %cst_45 [0] : vector<32x256xf32> to vector<256xf32>
    %83 = vector.shape_cast %82 : vector<256xf32> to vector<1x256xf32>
    %84 = arith.addf %83, %41 : vector<1x256xf32>
    %85 = arith.mulf %32, %80 : vector<32x256xf32>
    %cst_46 = arith.constant dense<0.000000e+00> : vector<256xf32>
    %86 = vector.multi_reduction <add>, %85, %cst_46 [0] : vector<32x256xf32> to vector<256xf32>
    %87 = vector.shape_cast %86 : vector<256xf32> to vector<1x256xf32>
    %88 = arith.addf %87, %44 : vector<1x256xf32>
    %89 = arith.mulf %35, %80 : vector<32x256xf32>
    %cst_47 = arith.constant dense<0.000000e+00> : vector<256xf32>
    %90 = vector.multi_reduction <add>, %89, %cst_47 [0] : vector<32x256xf32> to vector<256xf32>
    %91 = vector.shape_cast %90 : vector<256xf32> to vector<1x256xf32>
    %92 = arith.addf %91, %47 : vector<1x256xf32>
    %93 = arith.mulf %38, %80 : vector<32x256xf32>
    %cst_48 = arith.constant dense<0.000000e+00> : vector<256xf32>
    %94 = vector.multi_reduction <add>, %93, %cst_48 [0] : vector<32x256xf32> to vector<256xf32>
    %95 = vector.shape_cast %94 : vector<256xf32> to vector<1x256xf32>
    %96 = arith.addf %95, %50 : vector<1x256xf32>
    %97 = arith.mulf %84, %53 : vector<1x256xf32>
    %98 = arith.mulf %88, %54 : vector<1x256xf32>
    %99 = arith.addf %97, %98 : vector<1x256xf32>
    %100 = arith.mulf %92, %55 : vector<1x256xf32>
    %101 = arith.addf %99, %100 : vector<1x256xf32>
    %102 = arith.mulf %96, %56 : vector<1x256xf32>
    %103 = arith.addf %101, %102 : vector<1x256xf32>
    %104 = arith.subf %84, %103 : vector<1x256xf32>
    %105 = arith.mulf %53, %104 : vector<1x256xf32>
    %106 = arith.subf %88, %103 : vector<1x256xf32>
    %107 = arith.mulf %54, %106 : vector<1x256xf32>
    %108 = arith.subf %92, %103 : vector<1x256xf32>
    %109 = arith.mulf %55, %108 : vector<1x256xf32>
    %110 = arith.subf %96, %103 : vector<1x256xf32>
    %111 = arith.mulf %56, %110 : vector<1x256xf32>
    %112 = tpu.concatenate %105, %107, %109, %111 in 0 : vector<1x256xf32>, vector<1x256xf32>, vector<1x256xf32>, vector<1x256xf32> -> vector<4x256xf32>
    %c0_49 = arith.constant 0 : index
    %c0_50 = arith.constant 0 : index
    %113 = vector.load %arg9[%c0_49, %c0_50] : memref<4x256xf32, #tpu.memory_space<vmem>>, vector<4x256xf32>
    tpu.vector_store %arg9[%c0_49, %c0_50], %112 {strides = array<i32>} : memref<4x256xf32, #tpu.memory_space<vmem>>, vector<4x256xf32>,
    return
  }
  func.func @transform_0(%arg0: i32) -> i32 {
    %c0_i32 = arith.constant 0 : i32
    %c0_i32_0 = arith.constant 0 : i32
    return %c0_i32 : i32
  }
  func.func @transform_1(%arg0: i32) -> (i32, i32) {
    %c0_i32 = arith.constant 0 : i32
    %c0_i32_0 = arith.constant 0 : i32
    return %c0_i32, %arg0 : i32, i32
  }
  func.func @transform_2(%arg0: i32) -> (i32, i32) {
    %c0_i32 = arith.constant 0 : i32
    %c0_i32_0 = arith.constant 0 : i32
    %c0_i32_1 = arith.constant 0 : i32
    return %c0_i32, %c0_i32_0 : i32, i32
  }
  func.func @transform_3(%arg0: i32) -> (i32, i32) {
    %c0_i32 = arith.constant 0 : i32
    %c0_i32_0 = arith.constant 0 : i32
    %c0_i32_1 = arith.constant 0 : i32
    return %c0_i32, %c0_i32_0 : i32, i32
  }
  func.func @transform_4(%arg0: i32) -> (i32, i32, i32) {
    %c0_i32 = arith.constant 0 : i32
    %c0_i32_0 = arith.constant 0 : i32
    %c0_i32_1 = arith.constant 0 : i32
    %c0_i32_2 = arith.constant 0 : i32
    return %c0_i32, %c0_i32_0, %c0_i32_1 : i32, i32, i32
  }
  func.func @transform_5(%arg0: i32) -> (i32, i32, i32) {
    %c0_i32 = arith.constant 0 : i32
    %c0_i32_0 = arith.constant 0 : i32
    %c0_i32_1 = arith.constant 0 : i32
    %c0_i32_2 = arith.constant 0 : i32
    return %c0_i32, %c0_i32_0, %c0_i32_1 : i32, i32, i32
  }
  func.func @transform_6(%arg0: i32) -> (i32, i32) {
    %c0_i32 = arith.constant 0 : i32
    %c0_i32_0 = arith.constant 0 : i32
    %c0_i32_1 = arith.constant 0 : i32
    return %c0_i32, %c0_i32_0 : i32, i32
  }
  func.func @transform_7(%arg0: i32) -> (i32, i32) {
    %c0_i32 = arith.constant 0 : i32
    %c0_i32_0 = arith.constant 0 : i32
    %c0_i32_1 = arith.constant 0 : i32
    return %c0_i32, %c0_i32_0 : i32, i32
  }
  func.func @transform_8(%arg0: i32) -> (i32, i32) {
    %c0_i32 = arith.constant 0 : i32
    %c0_i32_0 = arith.constant 0 : i32
    return %c0_i32, %arg0 : i32, i32
  }
}

</mosaic_0001>

<bundles_post_ra>
// kernel: tpu_custom_call.1
= control target key start
LH: loop header
LB: loop body
LE: loop exit
PB: predicated region body
PF: predicated region fallthrough
CT: control target
= control target key end

     0   :  { %13 = vsyncpa [#allocation4], 0  ;;  %s2079_s0 = inlined_call_operand.vmem [shape: f32[2], index: 0, kind: input, shape index: {}]   ;;  %s2080_s1 = inlined_call_operand.vmem [shape: f32[4,512], index: 1, kind: input, shape index: {}]   ;;  %s2081_s2 = inlined_call_operand.vmem [shape: f32[32,4], index: 2, kind: input, shape index: {}]   ;;  %s2082_s3 = inlined_call_operand.vmem [shape: f32[32,1], index: 3, kind: input, shape index: {}]   ;;  %s2083_s4 = inlined_call_operand.vmem [shape: f32[2,32,32], index: 4, kind: input, shape index: {}]   ;;  %s2084_s5 = inlined_call_operand.vmem [shape: f32[2,32,1], index: 5, kind: input, shape index: {}]   ;;  %s2085_s6 = inlined_call_operand.vmem [shape: f32[32,4], index: 6, kind: input, shape index: {}]   ;;  %s2086_s7 = inlined_call_operand.vmem [shape: f32[4,1], index: 7, kind: input, shape index: {}]   ;;  %s2087_s8 = inlined_call_operand.hbm [shape: f32[4,512], index: 8, kind: output, shape index: {}]  }
   0x1   :  { %14 = vsyncpa [#allocation3], 0 }
   0x2   :  { %16 = vsyncpa [#allocation3 + $0x1], 0  ;;  %s1597_s27 = smov 0   ;;  %s1599_s28 = smov 0  }
   0x3   :  { %s1601_s29 = smov 0   ;;  %s1603_s30 = smov 0  }
   0x4 LB: > { %s1618_s9 = sadd.s32 4294967295, %s1542_s30   ;;  %s1295_s10 = sadd.s32 4294967294, %s1542_s30   ;;  %s1542_s30 = sphi %s1603_s30, %s2094_s30   ;;  %s1538_s29 = sphi %s1601_s29, %s2093_s29   ;;  %s1534_s28 = sphi %s1599_s28, %s2092_s28   ;;  %s1530_s27 = sphi %s1597_s27, %s2091_s27  }
   0x5   : > { %s1622_s11 = sadd.s32 1, %s1542_s30   ;;  %s202_s12 = sadd.s32 1, %s1538_s29 }
   0x6   : > { %s199_s13 = ssub.s32 %s1542_s30, %s1622_s11  ;;  %p212_p0 = scmp.ne.s32.totalorder %s1538_s29, %s1534_s28 }
   0x7   : > { %p200_p1 = scmp.eq.s32.totalorder %s199_s13, 0  ;;  %p213_p2 = scmp.eq.s32.totalorder %s1618_s9, 1 }
   0x8   : > { %p218_p3 = scmp.ne.s32.totalorder %s1534_s28, %s1530_s27  ;;  %p219_p4 = scmp.eq.s32.totalorder %s1295_s10, 1 }
   0x9   : > { %s1633_s14 = scalar_select %p200_p1, %s1538_s29, %s202_s12  }
   0xa   : > { %p1635_p5 = por %p213_p2, %p212_p0  ;;  %p1639_p6 = por %p219_p4, %p218_p3 }
   0xb   : > { %p1296_p7 = scmp.ge.s32.totalorder %s1542_s30, 1  ;;  %p226_p8 = scmp.lt.s32.totalorder %s1542_s30, 3 }
   0xc   : > { %p1360_p9 = scmp.eq.s32.totalorder %s1618_s9, 0  ;;  %s239_s20 = sshll.u32 %s2079_s0, 4  ;;  %s240_s20 = int_to_ptr.vmem [resolvable:$true] %s239_s20 }
   0xd   : > { %p1646_p10 = pnand %p1296_p7, %p226_p8  ;;  %s1461_s21 = scalar_lea.vmem %s240_s20, 16 }
   0xe   : > { %p1462_p13 = scmp.ne.s32.totalorder %s240_s20, %s1461_s21  ;;  %p1469_p3 = scmp.lt.s32.totalorder %s240_s20, %s240_s20 }
   0xf   : > { %p1352_p11 = pneg %p1646_p10  ;;  %p1470_p4 = scmp.lt.s32.totalorder %s1461_s21, %s1461_s21 }
  0x11   : > { %p1353_p12 = pnand %p1360_p9, %p1352_p11  ;;  %p1471_p7 = por %p1470_p4, %p1469_p3 }
  0x13   : > { %p1463_p0 = pneg %p1353_p12 }
  0x15   : > { %p1464_p1 = pnand %p1463_p0, %p1462_p13 }
  0x17   : > { %p1465_p2 = pneg %p1464_p1 }
  0x19   : > { %p1472_p8 = pnand %p1471_p7, %p1465_p2 }
  0x1b   : > { %1475 = shalt.err (!%p1472_p8)
}
  0x1c   : > { %s1544_s22 = smov [#allocation2]   ;;  %279 = sbr.rel (%p1646_p10) target bundleno = 776 (0x308), region = 52 }
  0x1d   : > { %1355 = dma.vmem_to_smem (!%p1353_p12), %s240_s20, 16, %s1544_s22, [#allocation4]  }
  0x23   : > { %1521 = dma.done.wait (%p1360_p9), [#allocation4], 16  }
  0x24   : > { %1523 = vsyncadd (%p1360_p9), [#allocation4], 4294967280 }
  0x25   : > { %285 = sfence }
  0x26   : > { %v324_v0 = vld [vmem:[%s2081_s2 + $0x18] sm:$0xff]  ;;  %v321_v1 = vld [vmem:[%s2081_s2] sm:$0xff]  ;;  %v1545_v2 = vmov 1   ;;  %v322_v3 = vld [vmem:[%s2081_s2 + $0x8] sm:$0xff]  ;;  %v1546_v4 = vmov 0   ;;  %v1547_v8 = vmov 2   ;;  %v581_v27 = vlaneseq }
  0x27   : > { %1406 = vset.pattern.permute.xlu0 %v1545_v2  ;;  %1402 = vset.pattern.permute.xlu1 %v1545_v2  ;;  %v394_v5 = vld [vmem:[%s2082_s3 + $0x8] sm:$0xff]  ;;  %v393_v6 = vld [vmem:[%s2082_s3] sm:$0xff]  ;;  %v323_v7 = vld [vmem:[%s2081_s2 + $0x10] sm:$0xff]  ;;  %v1548_v10 = vmov 3   ;;  %v1549_v12 = vmov 0.0   ;;  %s1302_s20 = sshll.u32 %s1618_s9, 1 }
  0x28   : > { %358 = vperm.xlu0 %1406, %v324_v0   ;;  %346 = vperm.xlu1 %1402, %v321_v1   ;;  %v395_v9 = vld [vmem:[%s2082_s3 + $0x10] sm:$0xff]  ;;  %v396_v11 = vld [vmem:[%s2082_s3 + $0x18] sm:$0xff]  ;;  %v426_v13 = vld [vmem:[%s2084_s5] sm:$0xff]  ;;  %p315_p9 = scmp.lt.s32.totalorder %s1302_s20, 3  ;;  %v1748_v30 = vshrl.u32 %v581_v27, 7  ;;  %vm688_vm0 = vcmask 261120  }
  0x29   : > { %765 = vmatprep.mubr.f32.mxu0 %v1549_v12  ;;  %891 = vmatprep.mubr.f32.mxu1 %v1549_v12  ;;  %v427_v14 = vld [vmem:[%s2084_s5 + $0x8] sm:$0xff]  ;;  %v429_v15 = vld [vmem:[%s2084_s5 + $0x18] sm:$0xff]  ;;  %v428_v16 = vld [vmem:[%s2084_s5 + $0x10] sm:$0xff]  ;;  %s571_s19 = sld [smem:[#allocation2]]  ;;  %s1312_s12 = sld [smem:[#allocation2 + $0x1]]  ;;  %vm1195_vm1 = vcmask 1040384  }
  0x2a   : > { %v1309_v17 = vld [vmem:[%s2084_s5 + $0x28] sm:$0xff]  ;;  %v1308_v18 = vld [vmem:[%s2084_s5 + $0x20] sm:$0xff]  ;;  %v1311_v19 = vld [vmem:[%s2084_s5 + $0x38] sm:$0xff]  ;;  %s2096_s20 = smov (!%p315_p9, %s1302_s20), 3  ;;  %v1756_v34 = vsub.s32 0, %v1748_v30  ;;  %v1759_v35 = vsub.s32 1, %v1748_v30 }
  0x2b   : > { %v1310_v20 = vld [vmem:[%s2084_s5 + $0x30] sm:$0xff]  ;;  %v1729_v21 = vld [vmem:[%s2085_s6 + $0x8] sm:$0xff]  ;;  %v1734_v22 = vld [vmem:[%s2085_s6] sm:$0xff]  ;;  %s1303_s21 = sshll.u32 %s2096_s20, 2  ;;  %s311_s13 = sand.u32 1, %s1534_s28   ;;  %vm1198_vm2 = vcmask 1041408  }
  0x2c   : > { %1407 = vset.pattern.permute.xlu0 %v1546_v4  ;;  %350 = vperm.xlu1 %1402, %v322_v3   ;;  %s318_s24 = scalar_lea.vmem %s2080_s1, %s1303_s21  ;;  %s2014_s17 = sshll.u32 %s311_s13, 3  ;;  %vm1201_vm3 = vcmask 1042432  }
  0x2d   : > { %327 = vperm.xlu0 %1407, %v321_v1   ;;  %v1753_v33 = vld [vmem:[%s318_s24] ss:$4 sm:$0x3]  ;;  %v1769_v40 = vld [vmem:[%s318_s24 + $0x1] ss:$4 sm:$0x3] }
  0x2e   : > { %v1763_v37 = vrot.slane %v1753_v33, %v1756_v34  ;;  %v1767_v38 = vrot.slane %v1753_v33, %v1759_v35  ;;  %v1775_v46 = vld [vmem:[%s318_s24 + $0x2] ss:$4 sm:$0x3]  ;;  %v1779_v47 = vrot.slane %v1769_v40, %v1756_v34  ;;  %v1783_v48 = vrot.slane %v1769_v40, %v1759_v35  ;;  %v1785_v50 = vld [vmem:[%s318_s24 + $0x3] ss:$4 sm:$0x3] }
  0x2f   : > { %v1789_v53 = vrot.slane %v1775_v46, %v1756_v34  ;;  %v1793_v54 = vrot.slane %v1775_v46, %v1759_v35  ;;  %v1797_v58 = vrot.slane %v1785_v50, %v1756_v34  ;;  %v1801_v59 = vrot.slane %v1785_v50, %v1759_v35  ;;  %s1329_s18 = sshll.u32 %s1618_s9, 7  ;;  %s1210_s9 = scalar_lea.sflag [#allocation3], %s311_s13 }
  0x30   : > { %1403 = vset.pattern.permute.xlu1 %v1546_v4  ;;  %s2035_s23 = scalar_lea.hbm %s2087_s8, %s1329_s18  ;;  %s1551_s25 = smov [#allocation5]  }
  0x31   : > { %332 = vperm.xlu0 %1407, %v322_v3   ;;  %404 = vperm.xlu1 %1403, %v394_v5   ;;  %s1480_s26 = sshll.u32 %s1551_s25, 4  ;;  %s1481_s26 = int_to_ptr.vmem [resolvable:$false] %s1480_s26 }
  0x32   : > { %s1482_s10 = scalar_lea.vmem %s1481_s26, 256 }
  0x35   : > { %399 = vperm.xlu0 %1407, %v393_v6   ;;  %342 = vperm.xlu1 %1403, %v324_v0  }
  0x39   : > { %337 = vperm.xlu0 %1407, %v323_v7   ;;  %1404 = vset.pattern.permute.xlu1 %v1547_v8 }
  0x3a   : > { %366 = vperm.xlu1 %1404, %v322_v3  }
  0x3d   : > { %409 = vperm.xlu0 %1407, %v395_v9  }
  0x3e   : > { %1405 = vset.pattern.permute.xlu1 %v1545_v2 }
  0x3f   : > { %354 = vperm.xlu1 %1405, %v323_v7  }
  0x41   : > { %1409 = vset.pattern.permute.xlu0 %v1547_v8 }
  0x42   : > { %362 = vperm.xlu0 %1409, %v321_v1  }
  0x43   : > { %1408 = vset.pattern.permute.xlu1 %v1548_v10 }
  0x44   : > { %378 = vperm.xlu1 %1408, %v321_v1  }
  0x46   : > { %374 = vperm.xlu0 %1409, %v324_v0  }
  0x48   : > { %382 = vperm.xlu1 %1408, %v322_v3  }
  0x4a   : > { %1413 = vset.pattern.permute.xlu0 %v1546_v4 }
  0x4b   : > { %432 = vperm.xlu0 %1413, %v426_v13  }
  0x4c   : > { %1410 = vset.pattern.permute.xlu1 %v1546_v4 }
  0x4d   : > { %414 = vperm.xlu1 %1410, %v396_v11  }
  0x4f   : > { %447 = vperm.xlu0 %1413, %v429_v15  }
  0x51   : > { %1411 = vset.pattern.permute.xlu1 %v1547_v8 }
  0x52   : > { %370 = vperm.xlu1 %1411, %v323_v7  }
  0x53   : > { %462 = vperm.xlu0 %1413, %v1309_v17  }
  0x56   : > { %1412 = vset.pattern.permute.xlu1 %v1548_v10 }
  0x57   : > { %386 = vperm.xlu1 %1412, %v323_v7   ;;  %472 = vperm.xlu0 %1413, %v1311_v19  }
  0x5b   : > { %390 = vperm.xlu1 %1412, %v324_v0   ;;  %486 = vperm.xlu0 %1413, %v1729_v21  }
  0x5f   : > { %1414 = vset.pattern.permute.xlu1 %v1546_v4  ;;  %1418 = vset.pattern.permute.xlu0 %v1547_v8 }
  0x60   : > { %437 = vperm.xlu1 %1414, %v427_v14   ;;  %516 = vperm.xlu0 %1418, %v1734_v22  }
  0x64   : > { %442 = vperm.xlu1 %1414, %v428_v16   ;;  %1419 = vset.pattern.permute.xlu0 %v1545_v2 }
  0x65   : > { %504 = vperm.xlu0 %1419, %v1729_v21  }
  0x68   : > { %457 = vperm.xlu1 %1414, %v1308_v18  }
  0x6c   : > { %467 = vperm.xlu1 %1414, %v1310_v20  }
  0x70   : > { %481 = vperm.xlu1 %1414, %v1734_v22  }
  0x74   : > { %1415 = vset.pattern.permute.xlu1 %v1545_v2 }
  0x75   : > { %500 = vperm.xlu1 %1415, %v1734_v22  }
  0x79   : > { %1416 = vset.pattern.permute.xlu1 %v1546_v4 }
  0xa7   : > { %v347_v23 = vpop.permute.xlu1 %346  ;;  %v1746_v24 = vpop.permute.xlu0 %358 }
  0xa8   : > { %v618_v60 = vmul.f32 %v1779_v47, %v347_v23  ;;  %v619_v61 = vmul.f32 %v1783_v48, %v347_v23 }
  0xab   : > { %v351_v25 = vpop.permute.xlu1 %350 }
  0xac   : > { %v328_v26 = vpop.permute.xlu0 %327  ;;  %v620_v0 = vmul.f32 %v1779_v47, %v351_v25  ;;  %v621_v1 = vmul.f32 %v1783_v48, %v351_v25 }
  0xad   : > { %v591_v41 = vmul.f32 %v1763_v37, %v328_v26  ;;  %v592_v42 = vmul.f32 %v1767_v38, %v328_v26 }
  0xb0   : > { %v333_v28 = vpop.permute.xlu0 %332  ;;  %v405_v29 = vpop.permute.xlu1 %404 }
  0xb1   : > { %v593_v44 = vmul.f32 %v1763_v37, %v333_v28  ;;  %v594_v45 = vmul.f32 %v1767_v38, %v333_v28 }
  0xb3   : > { %v601_v55 = vadd.f32 %v593_v44, %v405_v29  ;;  %v602_v56 = vadd.f32 %v594_v45, %v405_v29 }
  0xb4   : > { %v400_v31 = vpop.permute.xlu0 %399  ;;  %v343_v32 = vpop.permute.xlu1 %342 }
  0xb5   : > { %v599_v51 = vadd.f32 %v591_v41, %v400_v31  ;;  %v600_v52 = vadd.f32 %v592_v42, %v400_v31  ;;  %v628_v11 = vadd.f32 %v620_v0, %v601_v55  ;;  %v629_v13 = vadd.f32 %v621_v1, %v602_v56 }
  0xb6   : > { %v597_v42 = vmul.f32 %v1763_v37, %v343_v32  ;;  %v598_v44 = vmul.f32 %v1767_v38, %v343_v32 }
  0xb7   : > { %v626_v5 = vadd.f32 %v618_v60, %v599_v51  ;;  %v627_v6 = vadd.f32 %v619_v61, %v600_v52  ;;  %v624_v60 = vmul.f32 %v1779_v47, %v1746_v24  ;;  %v625_v61 = vmul.f32 %v1783_v48, %v1746_v24 }
  0xb8   : > { %v338_v36 = vpop.permute.xlu0 %337 }
  0xb9   : > { %v367_v39 = vpop.permute.xlu1 %366  ;;  %v595_v45 = vmul.f32 %v1763_v37, %v338_v36  ;;  %v596_v51 = vmul.f32 %v1767_v38, %v338_v36 }
  0xba   : > { %v647_v7 = vmul.f32 %v1789_v53, %v367_v39  ;;  %v648_v9 = vmul.f32 %v1793_v54, %v367_v39 }
  0xbc   : > { %v410_v43 = vpop.permute.xlu0 %409  ;;  %v655_v19 = vadd.f32 %v647_v7, %v628_v11  ;;  %v656_v20 = vadd.f32 %v648_v9, %v629_v13 }
  0xbe   : > { %v355_v49 = vpop.permute.xlu1 %354 }
  0xbf   : > { %v622_v0 = vmul.f32 %v1779_v47, %v355_v49  ;;  %v623_v32 = vmul.f32 %v1783_v48, %v355_v49 }
  0xc1   : > { %v363_v57 = vpop.permute.xlu0 %362 }
  0xc2   : > { %v645_v62 = vmul.f32 %v1789_v53, %v363_v57  ;;  %v646_v63 = vmul.f32 %v1793_v54, %v363_v57 }
  0xc3   : > { %v379_v3 = vpop.permute.xlu1 %378 }
  0xc4   : > { %v653_v14 = vadd.f32 %v645_v62, %v626_v5  ;;  %v654_v15 = vadd.f32 %v646_v63, %v627_v6  ;;  %v672_v16 = vmul.f32 %v1797_v58, %v379_v3  ;;  %v673_v17 = vmul.f32 %v1801_v59, %v379_v3 }
  0xc5   : > { %v375_v57 = vpop.permute.xlu0 %374  ;;  %v603_v62 = vadd.f32 %v595_v45, %v410_v43  ;;  %v604_v63 = vadd.f32 %v596_v51, %v410_v43  ;;  %v419_v45 = vld [vmem:[%s2083_s4 + $0x10] sm:$0xff]  ;;  %v420_v51 = vld [vmem:[%s2083_s4 + $0x18] sm:$0xff] }
  0xc6   : > { %v1815_v26 = vadd.f32 %v673_v17, %v654_v15  ;;  %v1819_v28 = vadd.f32 %v672_v16, %v653_v14  ;;  %v651_v36 = vmul.f32 %v1789_v53, %v375_v57  ;;  %v652_v5 = vmul.f32 %v1793_v54, %v375_v57 }
  0xc7   : > { %v383_v18 = vpop.permute.xlu1 %382  ;;  %v630_v11 = vadd.f32 %v622_v0, %v603_v62  ;;  %v631_v13 = vadd.f32 %v623_v32, %v604_v63 }
  0xc8   : > { %v674_v23 = vmul.f32 %v1797_v58, %v383_v18  ;;  %v675_v25 = vmul.f32 %v1801_v59, %v383_v18 }
  0xca   : > { %v1817_v27 = vadd.f32 %v675_v25, %v656_v20  ;;  %v1821_v29 = vadd.f32 %v674_v23, %v655_v19 }
  0xcc   : > { %v415_v31 = vpop.permute.xlu1 %414  ;;  %v1330_v39 = vpack.c.bf16 %v1817_v27, %v1815_v26  ;;  %v1332_v41 = vpack.c.bf16 %v1821_v29, %v1819_v28 }
  0xcd   : > { %v605_v55 = vadd.f32 %v597_v42, %v415_v31  ;;  %v606_v56 = vadd.f32 %v598_v44, %v415_v31  ;;  %v417_v42 = vld [vmem:[%s2083_s4] sm:$0xff]  ;;  %v418_v44 = vld [vmem:[%s2083_s4 + $0x8] sm:$0xff] }
  0xce   : > { %1331 = vmatprep.subr.bf16.mxu0 %v1330_v39 }
  0xcf   : > { %1333 = vmatpush1.bf16.msra.mxu0 %v1332_v41  ;;  %v632_v1 = vadd.f32 %v624_v60, %v605_v55  ;;  %v633_v3 = vadd.f32 %v625_v61, %v606_v56  ;;  %v478_v55 = vld [vmem:[%s2085_s6 + $0x18] sm:$0xff]  ;;  %v553_v56 = vld [vmem:[%s2086_s7 + $0x1] sm:$0x1] }
  0xd0   : > { %512 = vperm.xlu0 %1419, %v478_v55  }
  0xd1   : > { %v371_v52 = vpop.permute.xlu1 %370  ;;  %v659_v14 = vadd.f32 %v651_v36, %v632_v1  ;;  %v660_v15 = vadd.f32 %v652_v5, %v633_v3  ;;  %v798_v36 = vstv %s571_s19  ;;  %s313_s19 = scalar_lea.vmem [#allocation5], %s2014_s17 }
  0xd2   : > { %v649_v7 = vmul.f32 %v1789_v53, %v371_v52  ;;  %v650_v9 = vmul.f32 %v1793_v54, %v371_v52  ;;  %v477_v52 = vld [vmem:[%s2085_s6 + $0x10] sm:$0xff]  ;;  %s1224_s20 = sshll.u32 %s313_s19, 4  ;;  %s2037_s20 = int_to_ptr.vmem [resolvable:$true] %s1224_s20 }
  0xd3   : > { %491 = vperm.xlu1 %1416, %v477_v52   ;;  %s1476_s24 = scalar_lea.vmem %s2037_s20, 128  ;;  %p1483_p13 = scmp.lt.s32.totalorder %s2037_s20, %s1481_s26 }
  0xd4   : > { %v657_v16 = vadd.f32 %v649_v7, %v630_v11  ;;  %v658_v17 = vadd.f32 %v650_v9, %v631_v13  ;;  %1424 = vset.pattern.permute.xlu0 %v1548_v10  ;;  %v799_v13 = vmul.f32 %v798_v36, %v1819_v28  ;;  %p1477_p10 = scmp.ne.s32.totalorder %s2037_s20, %s1476_s24  ;;  %p1484_p0 = scmp.lt.s32.totalorder %s1482_s10, %s1476_s24 }
  0xd5   : > { %536 = vperm.xlu0 %1424, %v1729_v21  }
  0xd6   : > { %v387_v6 = vpop.permute.xlu1 %386  ;;  %p1478_p11 = pnand %p1477_p10, %p1635_p5  ;;  %p1485_p1 = por %p1484_p0, %p1483_p13 }
  0xd7   : > { %v676_v24 = vmul.f32 %v1797_v58, %v387_v6  ;;  %v677_v43 = vmul.f32 %v1801_v59, %v387_v6  ;;  %1417 = vset.pattern.permute.xlu1 %v1545_v2  ;;  %v547_v2 = vld [vmem:[%s2086_s7] sm:$0x1] }
  0xd8   : > { %508 = vperm.xlu1 %1417, %v477_v52   ;;  %p1479_p12 = pneg %p1478_p11 }
  0xd9   : > { %v1845_v20 = vadd.f32 %v676_v24, %v657_v16  ;;  %v1847_v23 = vadd.f32 %v677_v43, %v658_v17  ;;  %544 = vperm.xlu0 %1424, %v478_v55  }
  0xda   : > { %v391_v49 = vpop.permute.xlu1 %390  ;;  %p1486_p2 = pnand %p1485_p1, %p1479_p12 }
  0xdb   : > { %v678_v18 = vmul.f32 %v1797_v58, %v391_v49  ;;  %v679_v19 = vmul.f32 %v1801_v59, %v391_v49 }
  0xdc   : > { %1420 = vset.pattern.permute.xlu1 %v1547_v8 }
  0xdd   : > { %v1849_v25 = vadd.f32 %v678_v18, %v659_v14  ;;  %v1851_v31 = vadd.f32 %v679_v19, %v660_v15  ;;  %520 = vperm.xlu1 %1420, %v1729_v21   ;;  %1428 = vset.pattern.permute.xlu0 %v1546_v4  ;;  %v559_v21 = vld [vmem:[%s2086_s7 + $0x2] sm:$0x1]  ;;  %v800_v15 = vmul.f32 %v798_v36, %v1815_v26 }
  0xde   : > { %556 = vperm.xlu0 %1428, %v553_v56   ;;  %v801_v19 = vmul.f32 %v798_v36, %v1821_v29  ;;  %v803_v26 = vmul.f32 %v798_v36, %v1845_v20 }
  0xdf   : > { %v1334_v39 = vpack.c.bf16 %v1851_v31, %v1847_v23  ;;  %v1336_v41 = vpack.c.bf16 %v1849_v25, %v1845_v20  ;;  %v438_v61 = vpop.permute.xlu1 %437  ;;  %v806_v20 = vmul.f32 %v798_v36, %v1851_v31  ;;  %v1305_v31 = vld [vmem:[%s2083_s4 + $0x28] sm:$0xff] }
  0xe1   : > { %1335 = vmatprep.subr.bf16.mxu0 %v1334_v39  ;;  %1421 = vset.pattern.permute.xlu1 %v1546_v4 }
  0xe2   : > { %1337 = vmatpush1.bf16.msra.mxu0 %v1336_v41  ;;  %496 = vperm.xlu1 %1421, %v478_v55   ;;  %v802_v41 = vmul.f32 %v798_v36, %v1817_v27 }
  0xe3   : > { %v443_v1 = vpop.permute.xlu1 %442 }
  0xe5   : > { %1316 = vmatmul.mubr.msk.f32.vlgmr.msra.gmra.mrb[0].mxu0 %vm688_vm0, %v417_v42 }
  0xe6   : > { %771 = vmatprep.mubr.f32.mxu0 %v1549_v12  ;;  %1422 = vset.pattern.permute.xlu1 %v1547_v8 }
  0xe7   : > { %524 = vperm.xlu1 %1422, %v477_v52  }
  0xe9   : > { %1317 = vmatmul.mubr.msk.f32.gmra.mrb[2].mxu0 %vm688_vm0, %v418_v44 }
  0xea   : > { %777 = vmatprep.mubr.f32.mxu0 %v1549_v12 }
  0xeb   : > { %1423 = vset.pattern.permute.xlu1 %v1548_v10 }
  0xec   : > { %532 = vperm.xlu1 %1423, %v1734_v22   ;;  %v433_v22 = vpop.permute.xlu0 %432 }
  0xed   : > { %1318 = vmatmul.mubr.msk.f32.gmra.mrb[4].mxu0 %vm688_vm0, %v419_v45 }
  0xee   : > { %783 = vmatprep.mubr.f32.mxu0 %v1549_v12 }
  0xf0   : > { %1425 = vset.pattern.permute.xlu1 %v1547_v8  ;;  %v565_v8 = vld [vmem:[%s2086_s7 + $0x3] sm:$0x1]  ;;  %v448_v9 = vpop.permute.xlu0 %447 }
  0xf1   : > { %1319 = vmatmul.mubr.msk.f32.gmra.mrb[6].mxu0 %vm688_vm0, %v420_v51  ;;  %528 = vperm.xlu1 %1425, %v478_v55  }
  0xf5   : > { %1426 = vset.pattern.permute.xlu1 %v1548_v10 }
  0xf6   : > { %540 = vperm.xlu1 %1426, %v477_v52   ;;  %v804_v52 = vmul.f32 %v798_v36, %v1847_v23 }
  0xfa   : > { %1427 = vset.pattern.permute.xlu1 %v1546_v4 }
  0xfb   : > { %550 = vperm.xlu1 %1427, %v547_v2   ;;  %v805_v2 = vmul.f32 %v798_v36, %v1849_v25  ;;  %v1304_v25 = vld [vmem:[%s2083_s4 + $0x20] sm:$0xff] }
  0xff   : > { %562 = vperm.xlu1 %1427, %v559_v21  }
 0x103   : > { %568 = vperm.xlu1 %1427, %v565_v8  }
 0x1b8   : > { %v767_v10 = vpop.f32.mrb[0].mxu0 }
 0x1b9   : > { %v768_v57 = vadd.f32 %v767_v10, %v433_v22  ;;  %v769_v60 = vpop.f32.mrb[1].mxu0 }
 0x1ba   : > { %v770_v62 = vadd.f32 %v769_v60, %v433_v22  ;;  %v1306_v60 = vld [vmem:[%s2083_s4 + $0x30] sm:$0xff] }
 0x1bb   : > { %1429 = vtanh.f32 %v768_v57 }
 0x1bc   : > { %1431 = vtanh.f32 %v770_v62  ;;  %v773_v4 = vpop.f32.mrb[2].mxu0  ;;  %v458_v62 = vpop.permute.xlu1 %457 }
 0x1bd   : > { %v774_v63 = vadd.f32 %v773_v4, %v438_v61  ;;  %v775_v0 = vpop.f32.mrb[3].mxu0 }
 0x1be   : > { %v776_v32 = vadd.f32 %v775_v0, %v438_v61  ;;  %v1307_v61 = vld [vmem:[%s2083_s4 + $0x38] sm:$0xff] }
 0x1bf   : > { %1433 = vtanh.f32 %v774_v63 }
 0x1c0   : > { %1435 = vtanh.f32 %v776_v32  ;;  %v779_v3 = vpop.f32.mrb[4].mxu0  ;;  %v468_v4 = vpop.permute.xlu1 %467 }
 0x1c1   : > { %v780_v5 = vadd.f32 %v779_v3, %v443_v1  ;;  %v781_v6 = vpop.f32.mrb[5].mxu0 }
 0x1c2   : > { %v782_v7 = vadd.f32 %v781_v6, %v443_v1  ;;  %v463_v1 = vpop.permute.xlu0 %462 }
 0x1c3   : > { %1437 = vtanh.f32 %v780_v5 }
 0x1c4   : > { %1439 = vtanh.f32 %v782_v7  ;;  %v785_v11 = vpop.f32.mrb[6].mxu0  ;;  %v1958_v63 = vpop.permute.xlu1 %481 }
 0x1c5   : > { %v1430_v24 = vpop.eup %1429  ;;  %v786_v43 = vadd.f32 %v785_v11, %v448_v9  ;;  %v787_v14 = vpop.f32.mrb[7].mxu0 }
 0x1c6   : > { %v1432_v49 = vpop.eup %1431  ;;  %v788_v16 = vadd.f32 %v787_v14, %v448_v9  ;;  %v1909_v17 = vadd.f32 %v1430_v24, %v799_v13  ;;  %v473_v36 = vpop.permute.xlu0 %472 }
 0x1c7   : > { %1441 = vtanh.f32 %v786_v43  ;;  %v1911_v18 = vadd.f32 %v1432_v49, %v800_v15 }
 0x1c8   : > { %1443 = vtanh.f32 %v788_v16  ;;  %v501_v0 = vpop.permute.xlu1 %500 }
 0x1c9   : > { %v1434_v39 = vpop.eup %1433 }
 0x1ca   : > { %v1436_v42 = vpop.eup %1435  ;;  %v1915_v28 = vadd.f32 %v1434_v39, %v801_v19 }
 0x1cb   : > { %v1917_v44 = vadd.f32 %v1436_v42, %v802_v41  ;;  %v924_v41 = vstv %s1312_s12 }
 0x1cc   : > { %v1340_v45 = vpack.c.bf16 %v1915_v28, %v1909_v17  ;;  %v1960_v32 = vpop.permute.xlu1 %491 }
 0x1cd   : > { %v1438_v51 = vpop.eup %1437  ;;  %v1338_v55 = vpack.c.bf16 %v1917_v44, %v1911_v18 }
 0x1ce   : > { %v1440_v29 = vpop.eup %1439  ;;  %v1925_v56 = vadd.f32 %v1438_v51, %v803_v26 }
 0x1cf   : > { %1339 = vmatprep.subr.bf16.mxu1 %v1338_v55  ;;  %v1927_v27 = vadd.f32 %v1440_v29, %v804_v52  ;;  %v925_v55 = vmul.f32 %v924_v41, %v1909_v17 }
 0x1d0   : > { %1341 = vmatpush1.bf16.msra.mxu1 %v1340_v45  ;;  %v1962_v3 = vpop.permute.xlu1 %508 }
 0x1d1   : > { %v1442_v21 = vpop.eup %1441  ;;  %v930_v17 = vmul.f32 %v924_v41, %v1927_v27 }
 0x1d2   : > { %v1444_v8 = vpop.eup %1443  ;;  %v1931_v22 = vadd.f32 %v1442_v21, %v805_v2  ;;  %v926_v21 = vmul.f32 %v924_v41, %v1911_v18 }
 0x1d3   : > { %v1933_v10 = vadd.f32 %v1444_v8, %v806_v20 }
 0x1d4   : > { %v1344_v23 = vpack.c.bf16 %v1931_v22, %v1925_v56  ;;  %v1964_v5 = vpop.permute.xlu1 %520 }
 0x1d5   : > { %v1342_v57 = vpack.c.bf16 %v1933_v10, %v1927_v27  ;;  %v932_v18 = vmul.f32 %v924_v41, %v1933_v10 }
 0x1d7   : > { %1343 = vmatprep.subr.bf16.mxu1 %v1342_v57 }
 0x1d8   : > { %1345 = vmatpush1.bf16.msra.mxu1 %v1344_v23  ;;  %v1968_v6 = vpop.permute.xlu1 %496 }
 0x1db   : > { %1320 = vmatmul.mubr.msk.f32.vlgmr.msra.gmra.mrb[0].mxu1 %vm688_vm0, %v1304_v25 }
 0x1dc   : > { %897 = vmatprep.mubr.f32.mxu1 %v1549_v12  ;;  %v1970_v43 = vpop.permute.xlu1 %524 }
 0x1df   : > { %1321 = vmatmul.mubr.msk.f32.gmra.mrb[2].mxu1 %vm688_vm0, %v1305_v31  ;;  %v927_v31 = vmul.f32 %v924_v41, %v1915_v28 }
 0x1e0   : > { %903 = vmatprep.mubr.f32.mxu1 %v1549_v12  ;;  %v533_v45 = vpop.permute.xlu1 %532 }
 0x1e3   : > { %1322 = vmatmul.mubr.msk.f32.gmra.mrb[4].mxu1 %vm688_vm0, %v1306_v60 }
 0x1e4   : > { %909 = vmatprep.mubr.f32.mxu1 %v1549_v12  ;;  %v1966_v12 = vpop.permute.xlu0 %486 }
 0x1e7   : > { %1323 = vmatmul.mubr.msk.f32.gmra.mrb[6].mxu1 %vm688_vm0, %v1307_v61  ;;  %v1977_v61 = vpop.permute.xlu1 %528 }
 0x1e8   : > { %v517_v7 = vpop.permute.xlu0 %516 }
 0x1ec   : > { %v505_v16 = vpop.permute.xlu0 %504 }
 0x1f0   : > { %v1972_v52 = vpop.permute.xlu0 %512 }
 0x2ae   : > { %v893_v9 = vpop.f32.mrb[0].mxu1 }
 0x2af   : > { %v894_v11 = vadd.f32 %v893_v9, %v458_v62  ;;  %v895_v13 = vpop.f32.mrb[1].mxu1  ;;  %v931_v9 = vmul.f32 %v924_v41, %v1931_v22 }
 0x2b0   : > { %v896_v24 = vadd.f32 %v895_v13, %v458_v62  ;;  %v928_v62 = vmul.f32 %v924_v41, %v1917_v44  ;;  %v537_v13 = vpop.permute.xlu0 %536 }
 0x2b1   : > { %1445 = vtanh.f32 %v894_v11 }
 0x2b2   : > { %1447 = vtanh.f32 %v896_v24  ;;  %v899_v14 = vpop.f32.mrb[2].mxu1 }
 0x2b3   : > { %v900_v15 = vadd.f32 %v899_v14, %v463_v1  ;;  %v901_v49 = vpop.f32.mrb[3].mxu1 }
 0x2b4   : > { %v902_v19 = vadd.f32 %v901_v49, %v463_v1 }
 0x2b5   : > { %1449 = vtanh.f32 %v900_v15 }
 0x2b6   : > { %1451 = vtanh.f32 %v902_v19  ;;  %v905_v39 = vpop.f32.mrb[4].mxu1 }
 0x2b7   : > { %v906_v42 = vadd.f32 %v905_v39, %v468_v4  ;;  %v907_v26 = vpop.f32.mrb[5].mxu1 }
 0x2b8   : > { %v908_v51 = vadd.f32 %v907_v26, %v468_v4  ;;  %v929_v4 = vmul.f32 %v924_v41, %v1925_v56 }
 0x2b9   : > { %1453 = vtanh.f32 %v906_v42 }
 0x2ba   : > { %1455 = vtanh.f32 %v908_v51  ;;  %v911_v29 = vpop.f32.mrb[6].mxu1 }
 0x2bb   : > { %v1446_v2 = vpop.eup %1445  ;;  %v912_v20 = vadd.f32 %v911_v29, %v473_v36  ;;  %v913_v8 = vpop.f32.mrb[7].mxu1 }
 0x2bc   : > { %v1448_v23 = vpop.eup %1447  ;;  %v933_v57 = vadd.f32 %v1446_v2, %v925_v55  ;;  %v914_v25 = vadd.f32 %v913_v8, %v473_v36 }
 0x2bd   : > { %v934_v60 = vadd.f32 %v1448_v23, %v926_v21  ;;  %1457 = vtanh.f32 %v912_v20 }
 0x2be   : > { %1459 = vtanh.f32 %v914_v25  ;;  %v997_v11 = vmul.f32 %v933_v57, %v517_v7  ;;  %v969_v36 = vmul.f32 %v933_v57, %v501_v0  ;;  %v1025_v49 = vmul.f32 %v933_v57, %v533_v45 }
 0x2bf   : > { %v1450_v1 = vpop.eup %1449  ;;  %v998_v14 = vmul.f32 %v934_v60, %v517_v7  ;;  %v970_v15 = vmul.f32 %v934_v60, %v501_v0  ;;  %v1026_v44 = vmul.f32 %v934_v60, %v533_v45  ;;  %v941_v27 = vmul.f32 %v933_v57, %v1958_v63  ;;  %v541_v7 = vpop.permute.xlu1 %540 }
 0x2c0   : > { %v1452_v28 = vpop.eup %1451  ;;  %v935_v24 = vadd.f32 %v1450_v1, %v927_v31  ;;  %v942_v56 = vmul.f32 %v934_v60, %v1958_v63 }
 0x2c1   : > { %v936_v19 = vadd.f32 %v1452_v28, %v928_v62 }
 0x2c2   : > { %v999_v39 = vmul.f32 %v935_v24, %v1964_v5  ;;  %v971_v42 = vmul.f32 %v935_v24, %v505_v16  ;;  %v1027_v10 = vmul.f32 %v935_v24, %v537_v13  ;;  %v943_v22 = vmul.f32 %v935_v24, %v1966_v12 }
 0x2c3   : > { %v1454_v41 = vpop.eup %1453  ;;  %v1000_v26 = vmul.f32 %v936_v19, %v1964_v5  ;;  %v972_v51 = vmul.f32 %v936_v19, %v505_v16  ;;  %v1028_v55 = vmul.f32 %v936_v19, %v537_v13  ;;  %v944_v0 = vmul.f32 %v936_v19, %v1966_v12 }
 0x2c4   : > { %v1456_v29 = vpop.eup %1455  ;;  %v1005_v45 = vadd.f32 %v999_v39, %v997_v11  ;;  %v977_v2 = vadd.f32 %v971_v42, %v969_v36  ;;  %v937_v21 = vadd.f32 %v1454_v41, %v929_v4  ;;  %v1033_v20 = vadd.f32 %v1027_v10, %v1025_v49  ;;  %v545_v11 = vpop.permute.xlu0 %544 }
 0x2c5   : > { %v1014_v63 = vadd.f32 %v1000_v26, %v998_v14  ;;  %v986_v8 = vadd.f32 %v972_v51, %v970_v15  ;;  %v938_v23 = vadd.f32 %v1456_v29, %v930_v17  ;;  %v1042_v57 = vadd.f32 %v1028_v55, %v1026_v44 }
 0x2c6   : > { %v1001_v25 = vmul.f32 %v937_v21, %v1970_v43  ;;  %v973_v31 = vmul.f32 %v937_v21, %v1962_v3  ;;  %v1029_v60 = vmul.f32 %v937_v21, %v541_v7  ;;  %v945_v5 = vmul.f32 %v937_v21, %v1960_v32 }
 0x2c7   : > { %v1458_v16 = vpop.eup %1457  ;;  %v1002_v62 = vmul.f32 %v938_v23, %v1970_v43  ;;  %v974_v12 = vmul.f32 %v938_v23, %v1962_v3  ;;  %v1030_v1 = vmul.f32 %v938_v23, %v541_v7  ;;  %v946_v4 = vmul.f32 %v938_v23, %v1960_v32 }
 0x2c8   : > { %v1460_v36 = vpop.eup %1459  ;;  %v1006_v13 = vadd.f32 %v1005_v45, %v1001_v25  ;;  %v939_v17 = vadd.f32 %v1458_v16, %v931_v9  ;;  %v978_v28 = vadd.f32 %v977_v2, %v973_v31  ;;  %v1034_v24 = vadd.f32 %v1033_v20, %v1029_v60 }
 0x2c9   : > { %v1015_v14 = vadd.f32 %v1014_v63, %v1002_v62  ;;  %v940_v15 = vadd.f32 %v1460_v36, %v932_v18  ;;  %v987_v49 = vadd.f32 %v986_v8, %v974_v12  ;;  %v1043_v19 = vadd.f32 %v1042_v57, %v1030_v1 }
 0x2ca   : > { %v975_v44 = vmul.f32 %v939_v17, %v1972_v52  ;;  %v1003_v39 = vmul.f32 %v939_v17, %v1977_v61  ;;  %v1031_v43 = vmul.f32 %v939_v17, %v545_v11  ;;  %v947_v3 = vmul.f32 %v939_v17, %v1968_v6 }
 0x2cb   : > { %v976_v42 = vmul.f32 %v940_v15, %v1972_v52  ;;  %v1004_v32 = vmul.f32 %v940_v15, %v1977_v61  ;;  %v1032_v10 = vmul.f32 %v940_v15, %v545_v11  ;;  %v948_v9 = vmul.f32 %v940_v15, %v1968_v6 }
 0x2cc   : > { %v979_v41 = vadd.f32 %v978_v28, %v975_v44  ;;  %v1007_v26 = vadd.f32 %v1006_v13, %v1003_v39  ;;  %v1035_v51 = vadd.f32 %v1034_v24, %v1031_v43  ;;  %v949_v18 = vadd.f32 %v943_v22, %v941_v27 }
 0x2cd   : > { %v988_v55 = vadd.f32 %v987_v49, %v976_v42  ;;  %v1016_v7 = vadd.f32 %v1015_v14, %v1004_v32  ;;  %v1044_v29 = vadd.f32 %v1043_v19, %v1032_v10  ;;  %v958_v45 = vadd.f32 %v944_v0, %v942_v56  ;;  %v551_v0 = vpop.permute.xlu1 %550  ;;  %v557_v32 = vpop.permute.xlu0 %556 }
 0x2ce   : > { %v980_v2 = vrot.slane %v979_v41, 4  ;;  %v1008_v21 = vrot.slane %v1007_v26, 4  ;;  %v1036_v20 = vrot.slane %v1035_v51, 4  ;;  %v950_v63 = vadd.f32 %v949_v18, %v945_v5 }
 0x2cf   : > { %v989_v8 = vrot.slane %v988_v55, 4  ;;  %v1017_v23 = vrot.slane %v1016_v7, 4  ;;  %v1045_v52 = vrot.slane %v1044_v29, 4  ;;  %v959_v57 = vadd.f32 %v958_v45, %v946_v4 }
 0x2d0   : > { %v981_v61 = vadd.f32 %v980_v2, %v979_v41  ;;  %v1009_v25 = vadd.f32 %v1008_v21, %v1007_v26  ;;  %v1037_v31 = vadd.f32 %v1036_v20, %v1035_v51  ;;  %v951_v6 = vadd.f32 %v950_v63, %v947_v3 }
 0x2d1   : > { %v990_v60 = vadd.f32 %v989_v8, %v988_v55  ;;  %v1018_v16 = vadd.f32 %v1017_v23, %v1016_v7  ;;  %v1046_v62 = vadd.f32 %v1045_v52, %v1044_v29  ;;  %v960_v27 = vadd.f32 %v959_v57, %v948_v9  ;;  %v563_v18 = vpop.permute.xlu1 %562 }
 0x2d2   : > { %v952_v22 = vrot.slane %v951_v6, 4  ;;  %v1010_v12 = vrot.slane %v1009_v25, 2  ;;  %v1038_v1 = vrot.slane %v1037_v31, 2  ;;  %v982_v56 = vrot.slane %v981_v61, 2 }
 0x2d3   : > { %v961_v11 = vrot.slane %v960_v27, 4  ;;  %v1019_v36 = vrot.slane %v1018_v16, 2  ;;  %v1047_v5 = vrot.slane %v1046_v62, 2  ;;  %v991_v13 = vrot.slane %v990_v60, 2 }
 0x2d4   : > { %v953_v17 = vadd.f32 %v952_v22, %v951_v6  ;;  %v1011_v28 = vadd.f32 %v1010_v12, %v1009_v25  ;;  %v1039_v4 = vadd.f32 %v1038_v1, %v1037_v31  ;;  %v983_v24 = vadd.f32 %v982_v56, %v981_v61 }
 0x2d5   : > { %v962_v14 = vadd.f32 %v961_v11, %v960_v27  ;;  %v1020_v15 = vadd.f32 %v1019_v36, %v1018_v16  ;;  %v1048_v49 = vadd.f32 %v1047_v5, %v1046_v62  ;;  %v992_v19 = vadd.f32 %v991_v13, %v990_v60  ;;  %v569_v16 = vpop.permute.xlu1 %568 }
 0x2d6   : > { %v954_v44 = vrot.slane %v953_v17, 2  ;;  %v1012_v39 = vrot.slane %v1011_v28, 1  ;;  %v984_v43 = vrot.slane %v983_v24, 1  ;;  %v1040_v41 = vrot.slane %v1039_v4, 1 }
 0x2d7   : > { %v963_v3 = vrot.slane %v962_v14, 2  ;;  %v1021_v42 = vrot.slane %v1020_v15, 1  ;;  %v993_v10 = vrot.slane %v992_v19, 1  ;;  %v1049_v55 = vrot.slane %v1048_v49, 1 }
 0x2d8   : > { %v955_v9 = vadd.f32 %v954_v44, %v953_v17  ;;  %v985_v26 = vadd.f32 %v984_v43, %v983_v24  ;;  %v1013_v45 = vadd.f32 %v1012_v39, %v1011_v28  ;;  %v1041_v23 = vadd.f32 %v1040_v41, %v1039_v4 }
 0x2d9   : > { %v964_v51 = vadd.f32 %v963_v3, %v962_v14  ;;  %v994_v7 = vadd.f32 %v993_v10, %v992_v19  ;;  %v1022_v20 = vadd.f32 %v1021_v42, %v1020_v15  ;;  %v1050_v57 = vadd.f32 %v1049_v55, %v1048_v49 }
 0x2da   : > { %v956_v29 = vrot.slane %v955_v9, 1  ;;  %v995_v2 = vadd.f32 %v985_v26, %v557_v32  ;;  %v1023_v25 = vadd.f32 %v1013_v45, %v563_v18  ;;  %v1550_v62 = vmov 1966171168  }
 0x2db   : > { %v965_v21 = vrot.slane %v964_v51, 1  ;;  %v996_v63 = vadd.f32 %v994_v7, %v557_v32  ;;  %v1024_v60 = vadd.f32 %v1022_v20, %v563_v18  ;;  %v1073_v27 = vunpack.c.l.s4 %v1550_v62 }
 0x2dc   : > { %v957_v8 = vadd.f32 %v956_v29, %v955_v9  ;;  %v1055_v31 = vmul.f32 %v995_v2, %v1779_v47  ;;  %v1051_v1 = vadd.f32 %v1041_v23, %v569_v16  ;;  %v1052_v11 = vadd.f32 %v1050_v57, %v569_v16 }
 0x2dd   : > { %v966_v52 = vadd.f32 %v965_v21, %v964_v51  ;;  %v1056_v22 = vmul.f32 %v996_v63, %v1783_v48  ;;  %v1059_v36 = vmul.f32 %v1023_v25, %v1789_v53  ;;  %v1060_v13 = vmul.f32 %v1024_v60, %v1793_v54 }
 0x2de   : > { %v967_v61 = vadd.f32 %v957_v8, %v551_v0  ;;  %v1074_v17 = vunpack.c.0.s8 %v1073_v27  ;;  %v1064_v4 = vmul.f32 %v1052_v11, %v1801_v59 }
 0x2df   : > { %v968_v6 = vadd.f32 %v966_v52, %v551_v0  ;;  %v1063_v0 = vmul.f32 %v1051_v1, %v1797_v58 }
 0x2e0   : > { %v1053_v12 = vmul.f32 %v967_v61, %v1763_v37  ;;  %v1077_v37 = vsub.s32 %v1074_v17, %v1748_v30 }
 0x2e1   : > { %v1054_v56 = vmul.f32 %v968_v6, %v1767_v38 }
 0x2e2   : > { %v1057_v5 = vadd.f32 %v1055_v31, %v1053_v12 }
 0x2e3   : > { %v1058_v47 = vadd.f32 %v1056_v22, %v1054_v56 }
 0x2e4   : > { %v1061_v28 = vadd.f32 %v1059_v36, %v1057_v5 }
 0x2e5   : > { %v1062_v24 = vadd.f32 %v1060_v13, %v1058_v47 }
 0x2e6   : > { %v1065_v48 = vadd.f32 %v1063_v0, %v1061_v28 }
 0x2e7   : > { %v1066_v14 = vadd.f32 %v1064_v4, %v1062_v24 }
 0x2e8   : > { %v1067_v38 = vsub.f32 %v967_v61, %v1065_v48  ;;  %v1088_v15 = vsub.f32 %v995_v2, %v1065_v48  ;;  %v1109_v49 = vsub.f32 %v1023_v25, %v1065_v48  ;;  %v1130_v53 = vsub.f32 %v1051_v1, %v1065_v48 }
 0x2e9   : > { %v1068_v19 = vsub.f32 %v968_v6, %v1066_v14  ;;  %v1089_v54 = vsub.f32 %v996_v63, %v1066_v14  ;;  %v1110_v44 = vsub.f32 %v1024_v60, %v1066_v14  ;;  %v1131_v39 = vsub.f32 %v1052_v11, %v1066_v14 }
 0x2eb   : > { %v1071_v43 = vcombine.low %v1067_v38, %v1068_v19  ;;  %v1092_v58 = vcombine.low %v1088_v15, %v1089_v54  ;;  %v1113_v3 = vcombine.low %v1109_v49, %v1110_v44  ;;  %v1134_v42 = vcombine.low %v1130_v53, %v1131_v39 }
 0x2ed   : > { %v1078_v59 = vrot.slane %v1071_v43, %v1077_v37  ;;  %v1099_v32 = vrot.slane %v1092_v58, %v1077_v37  ;;  %v1120_v10 = vrot.slane %v1113_v3, %v1077_v37  ;;  %v1141_v9 = vrot.slane %v1134_v42, %v1077_v37 }
 0x2ef   : > { %v1106_v30 = vrot.slane %v1099_v32, %v1077_v37  ;;  %v1085_v41 = vrot.slane %v1078_v59, %v1077_v37  ;;  %v1127_v26 = vrot.slane %v1120_v10, %v1077_v37  ;;  %v1148_v51 = vrot.slane %v1141_v9, %v1077_v37 }
 0x2f1   : > { %v1108_v18 = vmul.f32 %v1769_v40, %v1106_v30  ;;  %v1087_v55 = vmul.f32 %v1085_v41, %v1753_v33  ;;  %v1129_v7 = vmul.f32 %v1775_v46, %v1127_v26  ;;  %v1150_v29 = vmul.f32 %v1785_v50, %v1148_v51 }
 0x2f3   : > { %v1166_v45 = vrot.slane %v1108_v18, %v1756_v34  ;;  %v1170_v2 = vrot.slane %v1108_v18, %v1759_v35  ;;  %v1155_v21 = vrot.slane %v1087_v55, %v1756_v34  ;;  %v1159_v20 = vrot.slane %v1087_v55, %v1759_v35 }
 0x2f4   : > { %v1177_v40 = vrot.slane %v1129_v7, %v1756_v34  ;;  %v1181_v33 = vrot.slane %v1129_v7, %v1759_v35  ;;  %v1188_v46 = vrot.slane %v1150_v29, %v1756_v34  ;;  %v1192_v50 = vrot.slane %v1150_v29, %v1759_v35 }
 0x2f5   : > { %v1196_v63 = vsel %vm1195_vm1, %v1155_v21, %v1166_v45  ;;  %v1197_v8 = vsel %vm1195_vm1, %v1159_v20, %v1170_v2 }
 0x2f6   : > { %v1199_v23 = vsel %vm1198_vm2, %v1196_v63, %v1177_v40  ;;  %v1200_v52 = vsel %vm1198_vm2, %v1197_v8, %v1181_v33 }
 0x2f7   : > { %v1202_v57 = vsel %vm1201_vm3, %v1199_v23, %v1188_v46  ;;  %v1203_v61 = vsel %vm1201_vm3, %v1200_v52, %v1192_v50 }
 0x2f8   : > { %v1206_v25 = vcombine.low %v1202_v57, %v1203_v61 }
 0x2fa   : > { %1208 = vst [vmem:[%s313_s19] sm:$0xff] %v1206_v25 }
 0x2fb   : > { %1489 = shalt.err (!%p1486_p2)
}
 0x2fc   : > { %s1490_s12 = scalar_lea.hbm %s2035_s23, 128  ;;  %s1494_s18 = scalar_lea.hbm %s2087_s8, 256 }
 0x2fd   : > { %p1491_p3 = scmp.ne.s32.totalorder %s2035_s23, %s1490_s12  ;;  %p1495_p8 = scmp.lt.u32.totalorder %s2035_s23, %s2087_s8 }
 0x2fe   : > { %p1496_p9 = scmp.lt.u32.totalorder %s1494_s18, %s1490_s12  ;;  %p1498_p11 = scmp.lt.u32.totalorder %s1490_s12, %s2035_s23 }
 0x2ff   : > { %p1492_p4 = pnand %p1491_p3, %p1635_p5 }
 0x300   : > { %p1497_p10 = por %p1496_p9, %p1495_p8 }
 0x301   : > { %p1493_p7 = pneg %p1492_p4 }
 0x302   : > { %p1499_p12 = por %p1498_p11, %p1497_p10 }
 0x304   : > { %p1500_p13 = pnand %p1499_p12, %p1493_p7 }
 0x306   : > { %1503 = shalt.err (!%p1500_p13)
}
 0x307   : > { %1350 = dma.vmem_to_hbm [thread:$0]  (%p1635_p5), %s2037_s20, 128, %s2035_s23, %s1210_s9  }
 0x308 PF: > { %p1362_p0 = scmp.ge.s32.totalorder %s1542_s30, 2  ;;  %s1236_s22 = sand.u32 1, %s1530_s27  }
 0x309   : > { %s1237_s24 = scalar_lea.sflag [#allocation3], %s1236_s22 }
 0x30a   : > { %p1357_p1 = pnand %p1362_p0, %p1639_p6 }
 0x30c   : > { %1525 = dma.done.wait (!%p1357_p1), %s1237_s24, 128  }
 0x30d   : > { %1527 = vsyncadd (!%p1357_p1), %s1237_s24, 4294967168  ;;  %p19_p2 = scmp.ge.s32.totalorder %s1622_s11, 4   ;;  %s2091_s27 = smov %s1534_s28 }
 0x30e   : > { %s2092_s28 = smov %s1538_s29  ;;  %s2093_s29 = smov %s1633_s14 }
 0x30f   : > { %s2094_s30 = smov %s1622_s11  ;;  %21 = sbr.rel (!%p19_p2) target bundleno = 4 (0x4), region = 97 }
 0x316   :  { %1242 = vsyncpa [#allocation3], 1 }
 0x317   :  { %1244 = vsyncpa [#allocation3 + $0x1], 1 }
 0x318   :  { %1245 = vsyncpa [#allocation4], 1 }
 0x319   :  { %1247 = vsyncpa [#allocation4 + $0x1], 1 }

</bundles_post_ra>
